<compile_context>
chip_gen: v7x
topology: tpu7x:2x2x1
jax: 0.10.0
libtpu: 0.0.40
codegen_flags: <defaults>
</compile_context>

<pallas_src>
import jax
import jax.numpy as jnp
from jax.experimental import pallas as pl
from jax.experimental.pallas import tpu as pltpu


def _round_up(x, m):
    return ((x + m - 1) // m) * m


def encoder_tail_kernel(x_ref, w_ref, b_ref, o_ref):
    """Fused AdaptiveAvgPool2d((1,1)) + flatten + Linear for one batch tile.

    x_ref: (TN, HW, C) trunk feature tile (channels-last, C lane-dense)
    w_ref: (C, Ep)     bf16 embed weight (pre-transposed, E padded to Ep lanes)
    b_ref: (1, Ep)     f32 embed bias (zero-padded to Ep lanes)
    o_ref: (TN, Ep)    f32 output embeddings
    """
    inv_hw = 1.0 / float(x_ref.shape[1])
    # AdaptiveAvgPool2d((1,1)) + .view(N, -1): f32-accumulating reduce over the
    # HW axis directly on the input dtype (no materialized full-tile upcast);
    # the 1/HW average scale is applied in f32.
    pooled = jnp.sum(x_ref[...], axis=1, dtype=jnp.float32) * inv_hw    # (TN, C)
    # self.embed(features): bf16 x bf16 -> f32 accumulate on the MXU fast path.
    out = jnp.dot(pooled.astype(jnp.bfloat16), w_ref[...],
                  preferred_element_type=jnp.float32)
    o_ref[...] = (out + b_ref[...]).astype(o_ref.dtype)


def prepare_embed_params(w_embed, b_embed):
    """One-time (model-load) preprocessing of the frozen nn.Linear(C, E) params:
    transpose to (C, E), zero-pad E up to a lane-dense multiple of 128, and cast
    the weight to bf16 (MXU fast path). Bias stays f32."""
    E, C = w_embed.shape
    Ep = _round_up(E, 128)
    w_t = jnp.transpose(w_embed).astype(jnp.bfloat16)            # (C, E)
    w_t = jnp.pad(w_t, ((0, 0), (0, Ep - E)))                    # (C, Ep)
    b = jnp.pad(b_embed.astype(jnp.float32), (0, Ep - E)).reshape(1, Ep)
    return w_t, b


def encoder_cnn_forward(features_nhwc, w_t_bf16, b_pad_f32, embed_size, *, tile_n=None):
    """features_nhwc: (N, H, W, C) trunk feature map, channels-last (any float dtype)
    w_t_bf16:       (C, Ep) bf16 from prepare_embed_params
    b_pad_f32:      (1, Ep) f32  from prepare_embed_params
    returns:        (N, embed_size) float32 embeddings
    """
    N, H, W, C = features_nhwc.shape
    HW = H * W
    Cw, Ep = w_t_bf16.shape
    assert Cw == C and Ep % 128 == 0

    # channels-last -> (N, HW, C) is a free contiguous reshape; C is lane-dense.
    x = features_nhwc.reshape(N, HW, C)
    x_bytes = jnp.dtype(features_nhwc.dtype).itemsize

    # VMEM budget derived from the actual chip (v7x: 64 MiB, v5e/v6e: 128 MiB).
    try:
        vmem_cap = int(getattr(pltpu.get_tpu_info(), "vmem_capacity_bytes", 64 << 20))
    except Exception:
        vmem_cap = 64 << 20
    vmem_limit = min(vmem_cap * 3 // 4, 112 << 20)

    # Batch tile: multiple of 8 sublanes, sized so the double-buffered x tiles
    # fit in ~60% of the VMEM budget (rest: resident weight/bias, output
    # buffers, spill headroom).
    if tile_n is None:
        per_row = HW * C * x_bytes
        tile_n = (int(vmem_limit * 0.6) // (2 * per_row)) // 8 * 8
        tile_n = min(max(tile_n, 8), 256)
    TN = max(8, (int(tile_n) // 8) * 8)
    TN = min(TN, _round_up(N, 8))
    Np = _round_up(N, TN)
    if Np != N:
        # TODO(synk): a ragged last tile with masked writeback would avoid this
        # (small) pad pass; padded rows produce garbage that is sliced off below.
        x = jnp.pad(x, ((0, Np - N), (0, 0), (0, 0)))

    out = pl.pallas_call(
        encoder_tail_kernel,
        out_shape=jax.ShapeDtypeStruct((Np, Ep), jnp.float32),
        grid=(Np // TN,),
        in_specs=[
            # Feature map tiled along batch -> double-buffered DMA prefetch;
            # each (HW, C) slab is one large contiguous DMA row.
            pl.BlockSpec((TN, HW, C), lambda i: (i, 0, 0)),
            # Weight / bias: constant index map -> resident across the grid.
            pl.BlockSpec((C, Ep), lambda i: (0, 0)),
            pl.BlockSpec((1, Ep), lambda i: (0, 0)),
        ],
        out_specs=pl.BlockSpec((TN, Ep), lambda i: (i, 0)),
        compiler_params=pltpu.CompilerParams(
            dimension_semantics=("parallel",),   # megacore sharding on v7x (2 TCs)
            vmem_limit_bytes=vmem_limit,
        ),
    )(x, w_t_bf16, b_pad_f32)
    return out[:N, :embed_size]


if __name__ == "__main__":
    # Small stand-in shapes for the trunk output (real ResNet-50: N x 7 x 7 x 2048).
    N, H, W, C = 2, 4, 4, 256
    EMBED = 32

    key = jax.random.PRNGKey(0)
    k_x, k_w, k_b = jax.random.split(key, 3)

    # Trunk feature map, channels-last (what a JAX conv trunk emits natively).
    feats = jax.random.normal(k_x, (N, H, W, C), dtype=jnp.float32)

    # nn.Linear(C, EMBED) init, PyTorch layout: weight (E, C), bias (E,).
    bound = 1.0 / jnp.sqrt(jnp.float32(C))
    w_embed = jax.random.uniform(k_w, (EMBED, C), jnp.float32, -bound, bound)
    b_embed = jax.random.uniform(k_b, (EMBED,), jnp.float32, -bound, bound)

    # One-time (model-load) preprocessing of the frozen embed params.
    w_t, b_pad = prepare_embed_params(w_embed, b_embed)

    out = encoder_cnn_forward(feats, w_t, b_pad, EMBED)
    out = jax.block_until_ready(out)

    # Reference: AdaptiveAvgPool2d((1,1)) + flatten + Linear in plain f32 JAX.
    ref = jnp.mean(feats, axis=(1, 2)) @ w_embed.T + b_embed
    assert out.shape == (N, EMBED)
    # Tolerance accounts for the bf16 MXU operands (weight + pooled features).
    assert jnp.allclose(out, ref, atol=2e-2, rtol=2e-2)

    print("KERNEL_OK")
</pallas_src>

<mosaic_0001>
module attributes {stable_mosaic.version = 11 : i64} {
  func.func @encoder_tail_kernel(%arg0: i32, %arg1: memref<8x16x256xf32, #tpu.memory_space<vmem>>, %arg2: memref<256x128xbf16, #tpu.memory_space<vmem>>, %arg3: memref<1x128xf32, #tpu.memory_space<vmem>>, %arg4: memref<8x128xf32, #tpu.memory_space<vmem>>) attributes {dimension_semantics = [#tpu.dimension_semantics<parallel>], iteration_bounds = array<i64: 1>, scalar_prefetch = 0 : i64, scratch_operands = 0 : i64, tpu.core_type = #tpu.core_type<tc>, window_params = [{transform_indices = @transform_0, window_bounds = array<i64: 8, 16, 256>}, {pipeline_mode = #tpu.pipeline_mode<synchronous>, transform_indices = @transform_1, window_bounds = array<i64: 256, 128>}, {pipeline_mode = #tpu.pipeline_mode<synchronous>, transform_indices = @transform_2, window_bounds = array<i64: 1, 128>}, {transform_indices = @transform_3, window_bounds = array<i64: 8, 128>}]} {
    %c0 = arith.constant 0 : index
    %c0_0 = arith.constant 0 : index
    %c0_1 = arith.constant 0 : index
    %0 = vector.load %arg1[%c0, %c0_0, %c0_1] : memref<8x16x256xf32, #tpu.memory_space<vmem>>, vector<8x16x256xf32>
    %cst = arith.constant dense<0.000000e+00> : vector<8x256xf32>
    %1 = vector.multi_reduction <add>, %0, %cst [1] : vector<8x16x256xf32> to vector<8x256xf32>
    %cst_2 = arith.constant 6.250000e-02 : f32
    %2 = vector.broadcast %cst_2 : f32 to vector<8x256xf32>
    %3 = arith.mulf %1, %2 : vector<8x256xf32>
    %4 = arith.truncf %3 : vector<8x256xf32> to vector<8x256xbf16>
    %c0_3 = arith.constant 0 : index
    %c0_4 = arith.constant 0 : index
    %5 = vector.load %arg2[%c0_3, %c0_4] : memref<256x128xbf16, #tpu.memory_space<vmem>>, vector<256x128xbf16>
    %cst_5 = arith.constant dense<0.000000e+00> : vector<8x128xf32>
    %6 = tpu.matmul %4, %5, %cst_5 {dimension_numbers = #tpu.dot_dimension_numbers<[1], [0], [0], [1], [0, 0, 1, 1], [], []>} : vector<8x256xbf16>, vector<256x128xbf16>, vector<8x128xf32> -> vector<8x128xf32>
    %c0_6 = arith.constant 0 : index
    %c0_7 = arith.constant 0 : index
    %7 = vector.load %arg3[%c0_6, %c0_7] : memref<1x128xf32, #tpu.memory_space<vmem>>, vector<1x128xf32>
    %8 = vector.broadcast %7 : vector<1x128xf32> to vector<8x128xf32>
    %9 = arith.addf %6, %8 : vector<8x128xf32>
    %c0_8 = arith.constant 0 : index
    %c0_9 = arith.constant 0 : index
    %10 = vector.load %arg4[%c0_8, %c0_9] : memref<8x128xf32, #tpu.memory_space<vmem>>, vector<8x128xf32>
    tpu.vector_store %arg4[%c0_8, %c0_9], %9 {strides = array<i32>} : memref<8x128xf32, #tpu.memory_space<vmem>>, vector<8x128xf32>,
    return
  }
  func.func @transform_0(%arg0: i32) -> (i32, i32, i32) {
    %c0_i32 = arith.constant 0 : i32
    %c0_i32_0 = arith.constant 0 : i32
    %c0_i32_1 = arith.constant 0 : i32
    return %arg0, %c0_i32, %c0_i32_0 : i32, i32, i32
  }
  func.func @transform_1(%arg0: i32) -> (i32, i32) {
    %c0_i32 = arith.constant 0 : i32
    %c0_i32_0 = arith.constant 0 : i32
    %c0_i32_1 = arith.constant 0 : i32
    return %c0_i32, %c0_i32_0 : i32, i32
  }
  func.func @transform_2(%arg0: i32) -> (i32, i32) {
    %c0_i32 = arith.constant 0 : i32
    %c0_i32_0 = arith.constant 0 : i32
    %c0_i32_1 = arith.constant 0 : i32
    return %c0_i32, %c0_i32_0 : i32, i32
  }
  func.func @transform_3(%arg0: i32) -> (i32, i32) {
    %c0_i32 = arith.constant 0 : i32
    %c0_i32_0 = arith.constant 0 : i32
    return %arg0, %c0_i32 : i32, i32
  }
}

</mosaic_0001>

<bundles_post_ra>
// kernel: tpu_custom_call.1
= control target key start
LH: loop header
LB: loop body
LE: loop exit
PB: predicated region body
PF: predicated region fallthrough
CT: control target
= control target key end

     0   :  { %8 = vsyncpa [#allocation3], 0  ;;  %s683_s0 = inlined_call_operand.hbm [shape: f32[8,16,256], index: 0, kind: input, shape index: {}]   ;;  %s684_s1 = inlined_call_operand.hbm [shape: bf16[256,128], index: 1, kind: input, shape index: {}]   ;;  %s685_s2 = inlined_call_operand.vmem [shape: f32[1,128], index: 2, kind: input, shape index: {}]   ;;  %s686_s3 = inlined_call_operand.hbm [shape: f32[8,128], index: 3, kind: output, shape index: {}]  }
   0x1   :  { %9 = vsyncpa [#allocation6], 0 }
   0x2   :  { %10 = vsyncpa [#allocation4], 0  ;;  %s603_s12 = smov [#allocation2]   ;;  %s531_s16 = scalar_lea.hbm %s683_s0, 4096 }
   0x3   :  { %s16_s13 = sshll.u32 %s603_s12, 4  ;;  %p532_p0 = scmp.ne.s32.totalorder %s683_s0, %s531_s16  ;;  %s17_s13 = int_to_ptr.vmem [resolvable:$true] %s16_s13 }
   0x4   :  { %p535_p1 = scmp.lt.u32.totalorder %s531_s16, %s683_s0 }
   0x6   :  { %p537_p2 = pnand %p535_p1, %p532_p0 }
   0x8   :  { %540 = shalt.err (!%p537_p2)
}
   0x9   :  { %s541_s21 = scalar_lea.vmem %s17_s13, 4096  ;;  %p546_p4 = scmp.lt.s32.totalorder %s17_s13, %s17_s13 }
   0xa   :  { %p542_p3 = scmp.ne.s32.totalorder %s17_s13, %s541_s21  ;;  %p547_p5 = scmp.lt.s32.totalorder %s541_s21, %s541_s21 }
   0xc   :  { %p548_p6 = por %p547_p5, %p546_p4 }
   0xe   :  { %p549_p7 = pnand %p548_p6, %p542_p3 }
  0x10   :  { %552 = shalt.err (!%p549_p7)
}
  0x11   :  { %s604_s22 = smov 256   ;;  %s605_s23 = smov 16  }
  0x12   :  { %22 = dma.hbm_to_vmem [thread:$0]  %s683_s0, 4096, %s17_s13, [#allocation3], %s604_s22, %s604_s22, %s605_s23  }
  0x13   :  { %s606_s26 = smov [#allocation5]   ;;  %s553_s30 = scalar_lea.hbm %s684_s1, 2048 }
  0x14   :  { %s28_s27 = sshll.u32 %s606_s26, 4  ;;  %p554_p8 = scmp.ne.s32.totalorder %s684_s1, %s553_s30  ;;  %s29_s27 = int_to_ptr.vmem [resolvable:$true] %s28_s27 }
  0x15   :  { %p557_p9 = scmp.lt.u32.totalorder %s553_s30, %s684_s1 }
  0x17   :  { %p559_p10 = pnand %p557_p9, %p554_p8 }
  0x19   :  { %562 = shalt.err (!%p559_p10)
}
  0x1a   :  { %s563_s8 = scalar_lea.vmem %s29_s27, 2048  ;;  %p568_p12 = scmp.lt.s32.totalorder %s29_s27, %s29_s27 }
  0x1b   :  { %p564_p11 = scmp.ne.s32.totalorder %s29_s27, %s563_s8  ;;  %p569_p13 = scmp.lt.s32.totalorder %s563_s8, %s563_s8 }
  0x1d   :  { %p570_p0 = por %p569_p13, %p568_p12 }
  0x1f   :  { %p571_p1 = pnand %p570_p0, %p564_p11 }
  0x21   :  { %574 = shalt.err (!%p571_p1)
}
  0x22   :  { %s607_s0 = smov 64   ;;  %s608_s9 = smov 4  }
  0x23   :  { %34 = dma.hbm_to_vmem [thread:$0]  %s684_s1, 2048, %s29_s27, [#allocation6], %s607_s0, %s607_s0, %s608_s9  }
  0x24   :  { %597 = dma.done.wait [#allocation3], 4096  }
  0x25   :  { %598 = vsyncadd [#allocation3], 4294963200 }
  0x26   :  { %599 = dma.done.wait [#allocation6], 2048  }
  0x27   :  { %600 = vsyncadd [#allocation6], 4294965248  ;;  %v515_v0 = vld [vmem:[#allocation5 + $0x40] sm:$0xff]   ;;  %v517_v2 = vld [vmem:[#allocation5 + $0x48] sm:$0xff]   ;;  %vm291_vm0 = vcmask 1041409   ;;  %vm293_vm1 = vcmask 1042434  }
  0x28   :  { %v516_v1 = vld [vmem:[#allocation5] sm:$0xff]   ;;  %486 = vmatprep.subr.bf16.mxu0 %v515_v0  ;;  %v518_v3 = vld [vmem:[#allocation5 + $0x8] sm:$0xff]   ;;  %v519_v4 = vld [vmem:[#allocation5 + $0x50] sm:$0xff]   ;;  %vm295_vm2 = vcmask 1043459   ;;  %vm297_vm3 = vcmask 1044484   ;;  %vm299_vm4 = vcmask 1045509  }
  0x29   :  { %487 = vmatpush3.bf16.msra.mxu0 %v516_v1  ;;  %v520_v5 = vld [vmem:[#allocation5 + $0x10] sm:$0xff]   ;;  %v521_v6 = vld [vmem:[#allocation5 + $0x58] sm:$0xff]   ;;  %v523_v8 = vld [vmem:[#allocation5 + $0x60] sm:$0xff]   ;;  %vm301_vm5 = vcmask 1046534   ;;  %vm303_vm6 = vcmask 1047559   ;;  %s609_s13 = smov [#allocation7]  }
  0x2a   :  { %488 = vmatprep.subr.bf16.mxu0 %v517_v2  ;;  %v522_v7 = vld [vmem:[#allocation5 + $0x18] sm:$0xff]   ;;  %v524_v9 = vld [vmem:[#allocation5 + $0x20] sm:$0xff]   ;;  %v525_v10 = vld [vmem:[#allocation5 + $0x68] sm:$0xff]   ;;  %s459_s14 = sshll.u32 %s609_s13, 4  ;;  %s460_s14 = int_to_ptr.vmem [resolvable:$true] %s459_s14 }
  0x2b   :  { %v45_v11 = vld [vmem:[#allocation2 + $0x8] sm:$0xff]  ;;  %v47_v12 = vld [vmem:[#allocation2 + $0x18] sm:$0xff]  ;;  %v527_v19 = vld [vmem:[#allocation5 + $0x70] sm:$0xff]   ;;  %s575_s15 = scalar_lea.vmem %s460_s14, 128  ;;  %p580_p3 = scmp.lt.s32.totalorder %s460_s14, %s460_s14 }
  0x2c   :  { %v49_v13 = vld [vmem:[#allocation2 + $0x28] sm:$0xff]  ;;  %v51_v15 = vld [vmem:[#allocation2 + $0x38] sm:$0xff]  ;;  %v83_v18 = vadd.f32 %v47_v12, %v45_v11  ;;  %v528_v45 = vld [vmem:[#allocation5 + $0x30] sm:$0xff]   ;;  %p576_p2 = scmp.ne.s32.totalorder %s460_s14, %s575_s15  ;;  %p581_p4 = scmp.lt.s32.totalorder %s575_s15, %s575_s15 }
  0x2d   :  { %489 = vmatpush3.bf16.msra.mxu0 %v518_v3  ;;  %v526_v14 = vld [vmem:[#allocation5 + $0x28] sm:$0xff]   ;;  %v55_v17 = vld [vmem:[#allocation2 + $0x58] sm:$0xff]  ;;  %v97_v23 = vadd.f32 %v51_v15, %v49_v13 }
  0x2e   :  { %490 = vmatprep.subr.bf16.mxu0 %v519_v4  ;;  %v53_v16 = vld [vmem:[#allocation2 + $0x48] sm:$0xff]  ;;  %v59_v21 = vld [vmem:[#allocation2 + $0x78] sm:$0xff]  ;;  %v84_v28 = vrot.slane %v83_v18, 4  ;;  %p582_p5 = por %p581_p4, %p580_p3 }
  0x2f   :  { %v57_v20 = vld [vmem:[#allocation2 + $0x68] sm:$0xff]  ;;  %v111_v24 = vadd.f32 %v55_v17, %v53_v16  ;;  %v63_v25 = vld [vmem:[#allocation2 + $0x98] sm:$0xff]  ;;  %v98_v33 = vrot.slane %v97_v23, 4 }
  0x30   :  { %v61_v22 = vld [vmem:[#allocation2 + $0x88] sm:$0xff]  ;;  %v67_v27 = vld [vmem:[#allocation2 + $0xb8] sm:$0xff]  ;;  %v125_v29 = vadd.f32 %v59_v21, %v57_v20  ;;  %v85_v38 = vadd.f32 %v84_v28, %v83_v18  ;;  %p583_p6 = pnand %p582_p5, %p576_p2 }
  0x31   :  { %491 = vmatpush3.bf16.msra.mxu0 %v520_v5  ;;  %v65_v26 = vld [vmem:[#allocation2 + $0xa8] sm:$0xff]  ;;  %v71_v31 = vld [vmem:[#allocation2 + $0xd8] sm:$0xff]  ;;  %v112_v34 = vrot.slane %v111_v24, 4  ;;  %v139_v35 = vadd.f32 %v63_v25, %v61_v22  ;;  %v99_v41 = vadd.f32 %v98_v33, %v97_v23  ;;  %v46_v33 = vld [vmem:[#allocation2 + $0x10] sm:$0xff] }
  0x32   :  { %492 = vmatprep.subr.bf16.mxu0 %v521_v6  ;;  %v69_v30 = vld [vmem:[#allocation2 + $0xc8] sm:$0xff]  ;;  %v153_v36 = vadd.f32 %v67_v27, %v65_v26  ;;  %v75_v37 = vld [vmem:[#allocation2 + $0xf8] sm:$0xff]  ;;  %v126_v39 = vrot.slane %v125_v29, 4  ;;  %v86_v46 = vrot.slane %v85_v38, 2 }
  0x33   :  { %v73_v32 = vld [vmem:[#allocation2 + $0xe8] sm:$0xff]  ;;  %v167_v40 = vadd.f32 %v71_v31, %v69_v30  ;;  %v113_v42 = vadd.f32 %v112_v34, %v111_v24  ;;  %v140_v43 = vrot.slane %v139_v35, 4  ;;  %v529_v50 = vld [vmem:[#allocation5 + $0x78] sm:$0xff]   ;;  %v100_v51 = vrot.slane %v99_v41, 2 }
  0x34   :  { %v154_v44 = vrot.slane %v153_v36, 4  ;;  %v127_v47 = vadd.f32 %v126_v39, %v125_v29  ;;  %v181_v49 = vadd.f32 %v75_v37, %v73_v32  ;;  %v87_v55 = vadd.f32 %v86_v46, %v85_v38  ;;  %v530_v63 = vld [vmem:[#allocation5 + $0x38] sm:$0xff]   ;;  %v44_v32 = vld [vmem:[#allocation2] sm:$0xff]  ;;  %v50_v39 = vld [vmem:[#allocation2 + $0x30] sm:$0xff] }
  0x35   :  { %493 = vmatpush3.bf16.msra.mxu0 %v522_v7  ;;  %v168_v48 = vrot.slane %v167_v40, 4  ;;  %v114_v52 = vrot.slane %v113_v42, 2  ;;  %v141_v53 = vadd.f32 %v140_v43, %v139_v35  ;;  %v101_v59 = vadd.f32 %v100_v51, %v99_v41  ;;  %v48_v38 = vld [vmem:[#allocation2 + $0x20] sm:$0xff] }
  0x36   :  { %494 = vmatprep.subr.bf16.mxu0 %v523_v8  ;;  %v155_v54 = vadd.f32 %v154_v44, %v153_v36  ;;  %v128_v56 = vrot.slane %v127_v47, 2  ;;  %v182_v58 = vrot.slane %v181_v49, 4  ;;  %v88_v0 = vrot.slane %v87_v55, 1  ;;  %v52_v44 = vld [vmem:[#allocation2 + $0x40] sm:$0xff] }
  0x37   :  { %v169_v57 = vadd.f32 %v168_v48, %v167_v40  ;;  %v115_v60 = vadd.f32 %v114_v52, %v113_v42  ;;  %v142_v61 = vrot.slane %v141_v53, 2  ;;  %v102_v4 = vrot.slane %v101_v59, 1  ;;  %v54_v48 = vld [vmem:[#allocation2 + $0x50] sm:$0xff] }
  0x38   :  { %v156_v62 = vrot.slane %v155_v54, 2  ;;  %v129_v1 = vadd.f32 %v128_v56, %v127_v47  ;;  %v183_v3 = vadd.f32 %v182_v58, %v181_v49  ;;  %v89_v8 = vadd.f32 %v88_v0, %v87_v55  ;;  %v56_v49 = vld [vmem:[#allocation2 + $0x60] sm:$0xff]  ;;  %v62_v56 = vld [vmem:[#allocation2 + $0x90] sm:$0xff] }
  0x39   :  { %495 = vmatpush3.bf16.msra.mxu0 %v524_v9  ;;  %v170_v2 = vrot.slane %v169_v57, 2  ;;  %v116_v5 = vrot.slane %v115_v60, 1  ;;  %v143_v6 = vadd.f32 %v142_v61, %v141_v53  ;;  %v103_v12 = vadd.f32 %v102_v4, %v101_v59  ;;  %v60_v55 = vld [vmem:[#allocation2 + $0x80] sm:$0xff]  ;;  %v66_v0 = vld [vmem:[#allocation2 + $0xb0] sm:$0xff] }
  0x3a   :  { %496 = vmatprep.subr.bf16.mxu0 %v525_v10  ;;  %v157_v7 = vadd.f32 %v156_v62, %v155_v54  ;;  %v130_v9 = vrot.slane %v129_v1, 1  ;;  %v184_v11 = vrot.slane %v183_v3, 2  ;;  %v76_v51 = vadd.f32 %v46_v33, %v44_v32 }
  0x3b   :  { %v171_v10 = vadd.f32 %v170_v2, %v169_v57  ;;  %v117_v13 = vadd.f32 %v116_v5, %v115_v60  ;;  %v191_v22 = vmul.f32 0.0625, %v103_v12  ;;  %v90_v57 = vadd.f32 %v50_v39, %v48_v38 }
  0x3c   :  { %v158_v15 = vrot.slane %v157_v7, 1  ;;  %v131_v16 = vadd.f32 %v130_v9, %v129_v1  ;;  %v185_v18 = vadd.f32 %v184_v11, %v183_v3  ;;  %v77_v61 = vrot.slane %v76_v51, 4 }
  0x3d   :  { %497 = vmatpush3.bf16.msra.mxu0 %v526_v14  ;;  %v144_v14 = vrot.slane %v143_v6, 1  ;;  %v172_v17 = vrot.slane %v171_v10, 1  ;;  %v193_v23 = vmul.f32 0.0625, %v117_v13  ;;  %v207_v30 = vpack.c.bf16 %v191_v22, %v191_v22  ;;  %v68_v13 = vld [vmem:[#allocation2 + $0xc0] sm:$0xff] }
  0x3e   :  { %498 = vmatprep.subr.bf16.mxu0 %v527_v19  ;;  %v189_v19 = vmul.f32 0.0625, %v89_v8  ;;  %v159_v21 = vadd.f32 %v158_v15, %v157_v7  ;;  %v186_v25 = vrot.slane %v185_v18, 1  ;;  %v195_v26 = vmul.f32 0.0625, %v131_v16 }
  0x3f   :  { %v145_v20 = vadd.f32 %v144_v14, %v143_v6  ;;  %v173_v24 = vadd.f32 %v172_v17, %v171_v10  ;;  %v209_v31 = vpack.c.bf16 %v193_v23, %v193_v23  ;;  %v278_v42 = vunpack.c.l.b16 %v207_v30  ;;  %v70_v14 = vld [vmem:[#allocation2 + $0xd0] sm:$0xff] }
  0x40   :  { %v205_v27 = vpack.c.bf16 %v189_v19, %v189_v19  ;;  %v199_v29 = vmul.f32 0.0625, %v159_v21  ;;  %v187_v34 = vadd.f32 %v186_v25, %v185_v18  ;;  %v211_v36 = vpack.c.bf16 %v195_v26, %v195_v26  ;;  %v72_v19 = vld [vmem:[#allocation2 + $0xe0] sm:$0xff] }
  0x41   :  { %499 = vmatpush3.bf16.msra.mxu0 %v528_v45  ;;  %v197_v28 = vmul.f32 0.0625, %v145_v20  ;;  %v201_v35 = vmul.f32 0.0625, %v173_v24  ;;  %v280_v43 = vunpack.c.l.b16 %v209_v31  ;;  %v91_v1 = vrot.slane %v90_v57, 4  ;;  %v74_v20 = vld [vmem:[#allocation2 + $0xf0] sm:$0xff] }
  0x42   :  { %500 = vmatprep.subr.bf16.mxu0 %v529_v50  ;;  %v276_v37 = vunpack.c.l.b16 %v205_v27  ;;  %v215_v41 = vpack.c.bf16 %v199_v29, %v199_v29  ;;  %v203_v45 = vmul.f32 0.0625, %v187_v34  ;;  %v282_v47 = vunpack.c.l.b16 %v211_v36  ;;  %v58_v50 = vld [vmem:[#allocation2 + $0x70] sm:$0xff] }
  0x43   :  { %v213_v40 = vpack.c.bf16 %v197_v28, %v197_v28  ;;  %v217_v46 = vpack.c.bf16 %v201_v35, %v201_v35  ;;  %v104_v2 = vadd.f32 %v54_v48, %v52_v44  ;;  %v118_v3 = vadd.f32 %v58_v50, %v56_v49 }
  0x44   :  { %v286_v53 = vunpack.c.l.b16 %v215_v41  ;;  %v305_v54 = vsel %vm291_vm0, %v278_v42, %v276_v37  ;;  %v219_v58 = vpack.c.bf16 %v203_v45, %v203_v45  ;;  %v78_v6 = vadd.f32 %v77_v61, %v76_v51 }
  0x45   :  { %501 = vmatpush3.bf16.msra.mxu0 %v530_v63  ;;  %v284_v52 = vunpack.c.l.b16 %v213_v40  ;;  %v288_v59 = vunpack.c.l.b16 %v217_v46  ;;  %v306_v60 = vsel %vm293_vm1, %v280_v43, %v305_v54  ;;  %v64_v63 = vld [vmem:[#allocation2 + $0xa0] sm:$0xff]  ;;  %v132_v7 = vadd.f32 %v62_v56, %v60_v55 }
  0x46   :  { %v307_v62 = vsel %vm295_vm2, %v282_v47, %v306_v60  ;;  %v290_v4 = vunpack.c.l.b16 %v219_v58  ;;  %v92_v9 = vadd.f32 %v91_v1, %v90_v57  ;;  %v105_v10 = vrot.slane %v104_v2, 4 }
  0x47   :  { %v308_v5 = vsel %vm297_vm3, %v284_v52, %v307_v62  ;;  %v119_v11 = vrot.slane %v118_v3, 4  ;;  %v79_v15 = vrot.slane %v78_v6, 2  ;;  %v133_v16 = vrot.slane %v132_v7, 4 }
  0x48   :  { %v309_v8 = vsel %vm299_vm4, %v286_v53, %v308_v5  ;;  %v146_v17 = vadd.f32 %v66_v0, %v64_v63  ;;  %v93_v21 = vrot.slane %v92_v9, 2  ;;  %v106_v22 = vadd.f32 %v105_v10, %v104_v2 }
  0x49   :  { %v310_v12 = vsel %vm301_vm5, %v288_v59, %v309_v8  ;;  %v120_v23 = vadd.f32 %v119_v11, %v118_v3  ;;  %v80_v25 = vadd.f32 %v79_v15, %v78_v6  ;;  %v134_v26 = vadd.f32 %v133_v16, %v132_v7 }
  0x4a   :  { %v311_v18 = vsel %vm303_vm6, %v290_v4, %v310_v12  ;;  %v147_v27 = vrot.slane %v146_v17, 4  ;;  %v94_v28 = vadd.f32 %v93_v21, %v92_v9  ;;  %v107_v29 = vrot.slane %v106_v22, 2 }
  0x4b   :  { %v313_v24 = vpack.c.b16 %v311_v18, %v311_v18  ;;  %v121_v30 = vrot.slane %v120_v23, 2  ;;  %v160_v31 = vadd.f32 %v70_v14, %v68_v13  ;;  %v81_v32 = vrot.slane %v80_v25, 1 }
  0x4c   :  { %v135_v33 = vrot.slane %v134_v26, 2  ;;  %v148_v34 = vadd.f32 %v147_v27, %v146_v17  ;;  %v174_v35 = vadd.f32 %v74_v20, %v72_v19  ;;  %v95_v36 = vrot.slane %v94_v28, 1 }
  0x4d   :  { %444 = vmatprep.mubr.bf16.mxu0 %v313_v24  ;;  %v108_v37 = vadd.f32 %v107_v29, %v106_v22  ;;  %v122_v38 = vadd.f32 %v121_v30, %v120_v23  ;;  %v161_v39 = vrot.slane %v160_v31, 4  ;;  %v82_v40 = vadd.f32 %v81_v32, %v80_v25 }
  0x4e   :  { %v136_v41 = vadd.f32 %v135_v33, %v134_v26  ;;  %v149_v42 = vrot.slane %v148_v34, 2  ;;  %v175_v43 = vrot.slane %v174_v35, 4  ;;  %v96_v44 = vadd.f32 %v95_v36, %v94_v28  ;;  %v469_v33 = vld [vmem:[%s685_s2] ss:$0 sm:$0xff] }
  0x4f   :  { %v109_v45 = vrot.slane %v108_v37, 1  ;;  %v123_v46 = vrot.slane %v122_v38, 1  ;;  %v162_v47 = vadd.f32 %v161_v39, %v160_v31  ;;  %v188_v51 = vmul.f32 0.0625, %v82_v40 }
  0x50   :  { %v137_v48 = vrot.slane %v136_v41, 1  ;;  %v150_v49 = vadd.f32 %v149_v42, %v148_v34  ;;  %v176_v50 = vadd.f32 %v175_v43, %v174_v35  ;;  %v190_v55 = vmul.f32 0.0625, %v96_v44 }
  0x51   :  { %v110_v52 = vadd.f32 %v109_v45, %v108_v37  ;;  %v124_v53 = vadd.f32 %v123_v46, %v122_v38  ;;  %v163_v54 = vrot.slane %v162_v47, 2  ;;  %v204_v59 = vpack.c.bf16 %v188_v51, %v188_v51 }
  0x52   :  { %v138_v56 = vadd.f32 %v137_v48, %v136_v41  ;;  %v151_v57 = vrot.slane %v150_v49, 1  ;;  %v177_v58 = vrot.slane %v176_v50, 2  ;;  %v206_v63 = vpack.c.bf16 %v190_v55, %v190_v55 }
  0x53   :  { %v164_v60 = vadd.f32 %v163_v54, %v162_v47  ;;  %v192_v61 = vmul.f32 0.0625, %v110_v52  ;;  %v194_v62 = vmul.f32 0.0625, %v124_v53  ;;  %v275_v3 = vunpack.c.l.b16 %v204_v59 }
  0x54   :  { %v152_v0 = vadd.f32 %v151_v57, %v150_v49  ;;  %v178_v1 = vadd.f32 %v177_v58, %v176_v50  ;;  %v196_v2 = vmul.f32 0.0625, %v138_v56  ;;  %v277_v7 = vunpack.c.l.b16 %v206_v63 }
  0x55   :  { %v165_v4 = vrot.slane %v164_v60, 1  ;;  %v208_v5 = vpack.c.bf16 %v192_v61, %v192_v61  ;;  %v210_v6 = vpack.c.bf16 %v194_v62, %v194_v62 }
  0x56   :  { %v179_v8 = vrot.slane %v178_v1, 1  ;;  %v198_v9 = vmul.f32 0.0625, %v152_v0  ;;  %v212_v10 = vpack.c.bf16 %v196_v2, %v196_v2  ;;  %v292_v14 = vsel %vm291_vm0, %v277_v7, %v275_v3 }
  0x57   :  { %v166_v11 = vadd.f32 %v165_v4, %v164_v60  ;;  %v279_v12 = vunpack.c.l.b16 %v208_v5  ;;  %v281_v13 = vunpack.c.l.b16 %v210_v6 }
  0x58   :  { %v180_v15 = vadd.f32 %v179_v8, %v178_v1  ;;  %v214_v16 = vpack.c.bf16 %v198_v9, %v198_v9  ;;  %v283_v17 = vunpack.c.l.b16 %v212_v10 }
  0x59   :  { %v200_v18 = vmul.f32 0.0625, %v166_v11  ;;  %v294_v19 = vsel %vm293_vm1, %v279_v12, %v292_v14 }
  0x5a   :  { %v202_v20 = vmul.f32 0.0625, %v180_v15  ;;  %v285_v21 = vunpack.c.l.b16 %v214_v16  ;;  %v296_v22 = vsel %vm295_vm2, %v281_v13, %v294_v19 }
  0x5b   :  { %v216_v23 = vpack.c.bf16 %v200_v18, %v200_v18  ;;  %v298_v24 = vsel %vm297_vm3, %v283_v17, %v296_v22 }
  0x5c   :  { %v218_v25 = vpack.c.bf16 %v202_v20, %v202_v20  ;;  %v300_v26 = vsel %vm299_vm4, %v285_v21, %v298_v24 }
  0x5d   :  { %v287_v27 = vunpack.c.l.b16 %v216_v23 }
  0x5e   :  { %v289_v28 = vunpack.c.l.b16 %v218_v25 }
  0x5f   :  { %v302_v29 = vsel %vm301_vm5, %v287_v27, %v300_v26 }
  0x60   :  { %v304_v30 = vsel %vm303_vm6, %v289_v28, %v302_v29 }
  0x61   :  { %v312_v31 = vpack.c.b16 %v304_v30, %v304_v30 }
  0x63   :  { %445 = vmatmul.mubr.bf16.vlgmr.msra.gmra.mrb[0].mxu0 %v312_v31 }
 0x136   :  { %v502_v32 = vpop.f32.mrb[0].mxu0 }
 0x137   :  { %v503_v34 = vpop.f32.mrb[1].mxu0 }
 0x138   :  { %v504_v35 = vadd.f32 %v503_v34, %v502_v32  ;;  %v505_v36 = vpop.f32.mrb[2].mxu0 }
 0x139   :  { %v506_v37 = vpop.f32.mrb[3].mxu0 }
 0x13a   :  { %v447_v38 = vadd.f32 %v504_v35, %v469_v33 }
 0x13c   :  { %452 = vst [vmem:[#allocation7] sm:$0xff] %v447_v38 }
 0x13d   :  { %586 = shalt.err (!%p583_p6)
}
 0x13e   :  { %s587_s2 = scalar_lea.hbm %s686_s3, 128 }
 0x13f   :  { %p588_p7 = scmp.ne.s32.totalorder %s686_s3, %s587_s2  ;;  %p591_p8 = scmp.lt.u32.totalorder %s587_s2, %s686_s3 }
 0x141   :  { %p593_p9 = pnand %p591_p8, %p588_p7 }
 0x143   :  { %596 = shalt.err (!%p593_p9)
}
 0x144   :  { %462 = dma.vmem_to_hbm [thread:$0]  %s460_s14, 128, %s686_s3, [#allocation4]  }
 0x145   :  { %601 = dma.done.wait [#allocation4], 128  }
 0x146   :  { %602 = vsyncadd [#allocation4], 4294967168 }
 0x147   :  { %466 = vsyncpa [#allocation3], 1 }
 0x148   :  { %467 = vsyncpa [#allocation6], 1 }
 0x149   :  { %468 = vsyncpa [#allocation4], 1 }

</bundles_post_ra>
